<compile_context>
chip_gen: v7x
topology: tpu7x:2x2x1
jax: 0.10.0
libtpu: 0.0.40
codegen_flags: <defaults>
</compile_context>

<pallas_src>
import jax
import jax.numpy as jnp
from jax.experimental import pallas as pl
from jax.experimental.pallas import tpu as pltpu

# Small shapes consistent with the module (original values in comments).
N_OF_FRAMES = 8            # 750
INPUT_SIZE = 16            # 188
HIDDEN_SIZE = 32           # 512
NUM_CLASSES = 8            # 56
GLOBAL_FEATURES_SIZE = 1   # 1
BATCH = 2


def _rnn_fused_kernel(x_ref, gf_ref, w_ih_ref, w_hh_ref, b_h_ref,
                      w_a_ref, w_g_ref, b_out_ref, o_ref, h_scr):
    """One time step of the RNN + fused classifier accumulation."""
    t = pl.program_id(0)

    @pl.when(t == 0)
    def _():
        h_scr[...] = jnp.zeros_like(h_scr)   # h_0 = 0 (PyTorch default)
        o_ref[...] = jnp.zeros_like(o_ref)

    x_t = x_ref[0]                           # (B, I)  current time slice
    h_new = jnp.tanh(
        jnp.dot(x_t, w_ih_ref[...], preferred_element_type=jnp.float32)
        + jnp.dot(h_scr[...], w_hh_ref[...], preferred_element_type=jnp.float32)
        + b_h_ref[...]
    )
    h_scr[...] = h_new

    # Classifier contribution of this time step (W_a streamed slice-by-slice).
    o_ref[...] += jnp.dot(h_new, w_a_ref[0], preferred_element_type=jnp.float32)

    @pl.when(t == pl.num_programs(0) - 1)
    def _():
        # global_features_size == 1 -> broadcast multiply instead of a K=1 matmul.
        o_ref[...] += gf_ref[...] * w_g_ref[...] + b_out_ref[...]


def rnn_forward(local_f, global_f, params):
    """Forward pass of the RNN module.

    local_f:  (B, T, I) float32
    global_f: (B, G)    float32 (G == 1)
    params:   (w_ih (I,H), w_hh (H,H), b_h (H,), w_a (T*H, C), w_g (G, C), b_out (C,))
    returns:  (B, C) float32 logits
    """
    w_ih, w_hh, b_h, w_a, w_g, b_out = params
    B, T, I = local_f.shape
    H = w_ih.shape[1]
    C = w_a.shape[-1]
    G = global_f.shape[1]
    assert G == 1, "kernel epilogue assumes global_features_size == 1"

    x_tm = jnp.transpose(local_f, (1, 0, 2))   # (T, B, I) time-major
    w_a3 = w_a.reshape(T, H, C)                # per-time-step classifier slices
    b_h2 = b_h.reshape(1, H)
    b_o2 = b_out.reshape(1, C)

    out = pl.pallas_call(
        _rnn_fused_kernel,
        out_shape=jax.ShapeDtypeStruct((B, C), jnp.float32),
        grid_spec=pltpu.PrefetchScalarGridSpec(
            num_scalar_prefetch=0,
            grid=(T,),
            in_specs=[
                pl.BlockSpec((1, B, I), lambda t: (t, 0, 0)),   # x_t slice
                pl.BlockSpec((B, G), lambda t: (0, 0)),         # global features
                pl.BlockSpec((I, H), lambda t: (0, 0)),         # W_ih (resident)
                pl.BlockSpec((H, H), lambda t: (0, 0)),         # W_hh (resident)
                pl.BlockSpec((1, H), lambda t: (0, 0)),         # b_ih + b_hh
                pl.BlockSpec((1, H, C), lambda t: (t, 0, 0)),   # W_a[t] slice
                pl.BlockSpec((G, C), lambda t: (0, 0)),         # W_g (resident)
                pl.BlockSpec((1, C), lambda t: (0, 0)),         # classifier bias
            ],
            out_specs=pl.BlockSpec((B, C), lambda t: (0, 0)),   # resident accumulator
            scratch_shapes=[pltpu.VMEM((B, H), jnp.float32)],   # hidden state
        ),
        compiler_params=pltpu.CompilerParams(
            dimension_semantics=("arbitrary",),   # recurrence is sequential
        ),
    )(x_tm, global_f, w_ih, w_hh, b_h2, w_a3, w_g, b_o2)
    return out


def init_params(key):
    """Deterministic init mimicking PyTorch defaults (uniform +-1/sqrt(fan_in))."""
    I, H, C, T, G = INPUT_SIZE, HIDDEN_SIZE, NUM_CLASSES, N_OF_FRAMES, GLOBAL_FEATURES_SIZE
    ks = jax.random.split(key, 6)
    bh = 1.0 / jnp.sqrt(float(H))
    bl = 1.0 / jnp.sqrt(float(T * H + G))
    w_ih = jax.random.uniform(ks[0], (I, H), jnp.float32, -bh, bh)
    w_hh = jax.random.uniform(ks[1], (H, H), jnp.float32, -bh, bh)
    b_h = jax.random.uniform(ks[2], (H,), jnp.float32, -bh, bh)   # b_ih + b_hh combined
    w_a = jax.random.uniform(ks[3], (T * H, C), jnp.float32, -bl, bl)
    w_g = jax.random.uniform(ks[4], (G, C), jnp.float32, -bl, bl)
    b_out = jax.random.uniform(ks[5], (C,), jnp.float32, -bl, bl)
    return (w_ih, w_hh, b_h, w_a, w_g, b_out)


def rnn_reference(local_f, global_f, params):
    """Pure-JAX reference of the same forward pass."""
    w_ih, w_hh, b_h, w_a, w_g, b_out = params
    B, T, I = local_f.shape
    H = w_ih.shape[1]

    def step(h, x_t):
        h_new = jnp.tanh(x_t @ w_ih + h @ w_hh + b_h)
        return h_new, h_new

    h0 = jnp.zeros((B, H), jnp.float32)
    _, hs = jax.lax.scan(step, h0, jnp.transpose(local_f, (1, 0, 2)))
    hs = jnp.transpose(hs, (1, 0, 2))            # (B, T, H)
    flat = hs.reshape(B, T * H)
    return flat @ w_a + global_f @ w_g + b_out


if __name__ == "__main__":
    key = jax.random.PRNGKey(0)
    key, k_lf, k_gf, k_p = jax.random.split(key, 4)

    local_f = jax.random.normal(k_lf, (BATCH, N_OF_FRAMES, INPUT_SIZE), jnp.float32)
    global_f = jax.random.normal(k_gf, (BATCH, GLOBAL_FEATURES_SIZE), jnp.float32)
    params = init_params(k_p)

    logits = rnn_forward(local_f, global_f, params)
    jax.block_until_ready(logits)
    assert logits.shape == (BATCH, NUM_CLASSES), logits.shape

    ref = rnn_reference(local_f, global_f, params)
    assert jnp.allclose(logits, ref, atol=1e-4, rtol=1e-4), (
        float(jnp.max(jnp.abs(logits - ref))))

    print("KERNEL_OK")
</pallas_src>

<mosaic_0001>
module attributes {stable_mosaic.version = 11 : i64} {
  func.func @_rnn_fused_kernel(%arg0: i32, %arg1: memref<1x2x16xf32, #tpu.memory_space<vmem>>, %arg2: memref<2x1xf32, #tpu.memory_space<vmem>>, %arg3: memref<16x32xf32, #tpu.memory_space<vmem>>, %arg4: memref<32x32xf32, #tpu.memory_space<vmem>>, %arg5: memref<1x32xf32, #tpu.memory_space<vmem>>, %arg6: memref<1x32x8xf32, #tpu.memory_space<vmem>>, %arg7: memref<1x8xf32, #tpu.memory_space<vmem>>, %arg8: memref<1x8xf32, #tpu.memory_space<vmem>>, %arg9: memref<2x8xf32, #tpu.memory_space<vmem>>, %arg10: memref<2x32xf32, #tpu.memory_space<vmem>>) attributes {dimension_semantics = [#tpu.dimension_semantics<arbitrary>], iteration_bounds = array<i64: 8>, scalar_prefetch = 0 : i64, scratch_operands = 1 : i64, tpu.core_type = #tpu.core_type<tc>, window_params = [{transform_indices = @transform_0, window_bounds = array<i64: 1, 2, 16>}, {pipeline_mode = #tpu.pipeline_mode<synchronous>, transform_indices = @transform_1, window_bounds = array<i64: 2, 1>}, {pipeline_mode = #tpu.pipeline_mode<synchronous>, transform_indices = @transform_2, window_bounds = array<i64: 16, 32>}, {pipeline_mode = #tpu.pipeline_mode<synchronous>, transform_indices = @transform_3, window_bounds = array<i64: 32, 32>}, {pipeline_mode = #tpu.pipeline_mode<synchronous>, transform_indices = @transform_4, window_bounds = array<i64: 1, 32>}, {transform_indices = @transform_5, window_bounds = array<i64: 1, 32, 8>}, {pipeline_mode = #tpu.pipeline_mode<synchronous>, transform_indices = @transform_6, window_bounds = array<i64: 1, 8>}, {pipeline_mode = #tpu.pipeline_mode<synchronous>, transform_indices = @transform_7, window_bounds = array<i64: 1, 8>}, {pipeline_mode = #tpu.pipeline_mode<synchronous>, transform_indices = @transform_8, window_bounds = array<i64: 2, 8>}]} {
    %c0_i32 = arith.constant 0 : i32
    %0 = arith.cmpi eq, %arg0, %c0_i32 : i32
    %1 = arith.extui %0 : i1 to i32
    %c0_i32_0 = arith.constant 0 : i32
    %2 = arith.cmpi ne, %1, %c0_i32_0 : i32
    scf.if %2 {
      %cst_23 = arith.constant 0.000000e+00 : f32
      %25 = vector.broadcast %cst_23 : f32 to vector<2x32xf32>
      %c0_24 = arith.constant 0 : index
      %c0_25 = arith.constant 0 : index
      %26 = vector.load %arg10[%c0_24, %c0_25] : memref<2x32xf32, #tpu.memory_space<vmem>>, vector<2x32xf32>
      tpu.vector_store %arg10[%c0_24, %c0_25], %25 {strides = array<i32>} : memref<2x32xf32, #tpu.memory_space<vmem>>, vector<2x32xf32>,
      %cst_26 = arith.constant 0.000000e+00 : f32
      %27 = vector.broadcast %cst_26 : f32 to vector<2x8xf32>
      %c0_27 = arith.constant 0 : index
      %c0_28 = arith.constant 0 : index
      %28 = vector.load %arg9[%c0_27, %c0_28] : memref<2x8xf32, #tpu.memory_space<vmem>>, vector<2x8xf32>
      tpu.vector_store %arg9[%c0_27, %c0_28], %27 {strides = array<i32>} : memref<2x8xf32, #tpu.memory_space<vmem>>, vector<2x8xf32>,
    } else {
    }
    %c0 = arith.constant 0 : index
    %c0_1 = arith.constant 0 : index
    %c0_2 = arith.constant 0 : index
    %3 = vector.load %arg1[%c0, %c0_1, %c0_2] : memref<1x2x16xf32, #tpu.memory_space<vmem>>, vector<1x2x16xf32>
    %4 = vector.shape_cast %3 : vector<1x2x16xf32> to vector<2x16xf32>
    %c0_3 = arith.constant 0 : index
    %c0_4 = arith.constant 0 : index
    %5 = vector.load %arg3[%c0_3, %c0_4] : memref<16x32xf32, #tpu.memory_space<vmem>>, vector<16x32xf32>
    %cst = arith.constant dense<0.000000e+00> : vector<2x32xf32>
    %6 = tpu.matmul %4, %5, %cst {dimension_numbers = #tpu.dot_dimension_numbers<[1], [0], [0], [1], [0, 0, 1, 1], [], []>} : vector<2x16xf32>, vector<16x32xf32>, vector<2x32xf32> -> vector<2x32xf32>
    %c0_5 = arith.constant 0 : index
    %c0_6 = arith.constant 0 : index
    %7 = vector.load %arg10[%c0_5, %c0_6] : memref<2x32xf32, #tpu.memory_space<vmem>>, vector<2x32xf32>
    %c0_7 = arith.constant 0 : index
    %c0_8 = arith.constant 0 : index
    %8 = vector.load %arg4[%c0_7, %c0_8] : memref<32x32xf32, #tpu.memory_space<vmem>>, vector<32x32xf32>
    %cst_9 = arith.constant dense<0.000000e+00> : vector<2x32xf32>
    %9 = tpu.matmul %7, %8, %cst_9 {dimension_numbers = #tpu.dot_dimension_numbers<[1], [0], [0], [1], [0, 0, 1, 1], [], []>} : vector<2x32xf32>, vector<32x32xf32>, vector<2x32xf32> -> vector<2x32xf32>
    %10 = arith.addf %6, %9 : vector<2x32xf32>
    %c0_10 = arith.constant 0 : index
    %c0_11 = arith.constant 0 : index
    %11 = vector.load %arg5[%c0_10, %c0_11] : memref<1x32xf32, #tpu.memory_space<vmem>>, vector<1x32xf32>
    %12 = vector.broadcast %11 : vector<1x32xf32> to vector<2x32xf32>
    %13 = arith.addf %10, %12 : vector<2x32xf32>
    %14 = math.tanh %13 : vector<2x32xf32>
    %c0_12 = arith.constant 0 : index
    %c0_13 = arith.constant 0 : index
    %15 = vector.load %arg10[%c0_12, %c0_13] : memref<2x32xf32, #tpu.memory_space<vmem>>, vector<2x32xf32>
    tpu.vector_store %arg10[%c0_12, %c0_13], %14 {strides = array<i32>} : memref<2x32xf32, #tpu.memory_space<vmem>>, vector<2x32xf32>,
    %c0_14 = arith.constant 0 : index
    %c0_15 = arith.constant 0 : index
    %16 = vector.load %arg9[%c0_14, %c0_15] : memref<2x8xf32, #tpu.memory_space<vmem>>, vector<2x8xf32>
    %c0_16 = arith.constant 0 : index
    %c0_17 = arith.constant 0 : index
    %c0_18 = arith.constant 0 : index
    %17 = vector.load %arg6[%c0_16, %c0_17, %c0_18] : memref<1x32x8xf32, #tpu.memory_space<vmem>>, vector<1x32x8xf32>
    %18 = vector.shape_cast %17 : vector<1x32x8xf32> to vector<32x8xf32>
    %cst_19 = arith.constant dense<0.000000e+00> : vector<2x8xf32>
    %19 = tpu.matmul %14, %18, %cst_19 {dimension_numbers = #tpu.dot_dimension_numbers<[1], [0], [0], [1], [0, 0, 1, 1], [], []>} : vector<2x32xf32>, vector<32x8xf32>, vector<2x8xf32> -> vector<2x8xf32>
    %20 = arith.addf %16, %19 : vector<2x8xf32>
    %c0_20 = arith.constant 0 : index
    %c0_21 = arith.constant 0 : index
    %21 = vector.load %arg9[%c0_20, %c0_21] : memref<2x8xf32, #tpu.memory_space<vmem>>, vector<2x8xf32>
    tpu.vector_store %arg9[%c0_20, %c0_21], %20 {strides = array<i32>} : memref<2x8xf32, #tpu.memory_space<vmem>>, vector<2x8xf32>,
    %c7_i32 = arith.constant 7 : i32
    %22 = arith.cmpi eq, %arg0, %c7_i32 : i32
    %23 = arith.extui %22 : i1 to i32
    %c0_i32_22 = arith.constant 0 : i32
    %24 = arith.cmpi ne, %23, %c0_i32_22 : i32
    scf.if %24 {
      %c0_23 = arith.constant 0 : index
      %c0_24 = arith.constant 0 : index
      %25 = vector.load %arg9[%c0_23, %c0_24] : memref<2x8xf32, #tpu.memory_space<vmem>>, vector<2x8xf32>
      %c0_25 = arith.constant 0 : index
      %c0_26 = arith.constant 0 : index
      %26 = vector.load %arg2[%c0_25, %c0_26] : memref<2x1xf32, #tpu.memory_space<vmem>>, vector<2x1xf32>
      %c0_27 = arith.constant 0 : index
      %c0_28 = arith.constant 0 : index
      %27 = vector.load %arg7[%c0_27, %c0_28] : memref<1x8xf32, #tpu.memory_space<vmem>>, vector<1x8xf32>
      %28 = vector.broadcast %26 : vector<2x1xf32> to vector<2x8xf32>
      %29 = vector.broadcast %27 : vector<1x8xf32> to vector<2x8xf32>
      %30 = arith.mulf %28, %29 : vector<2x8xf32>
      %c0_29 = arith.constant 0 : index
      %c0_30 = arith.constant 0 : index
      %31 = vector.load %arg8[%c0_29, %c0_30] : memref<1x8xf32, #tpu.memory_space<vmem>>, vector<1x8xf32>
      %32 = vector.broadcast %31 : vector<1x8xf32> to vector<2x8xf32>
      %33 = arith.addf %30, %32 : vector<2x8xf32>
      %34 = arith.addf %25, %33 : vector<2x8xf32>
      %c0_31 = arith.constant 0 : index
      %c0_32 = arith.constant 0 : index
      %35 = vector.load %arg9[%c0_31, %c0_32] : memref<2x8xf32, #tpu.memory_space<vmem>>, vector<2x8xf32>
      tpu.vector_store %arg9[%c0_31, %c0_32], %34 {strides = array<i32>} : memref<2x8xf32, #tpu.memory_space<vmem>>, vector<2x8xf32>,
    } else {
    }
    return
  }
  func.func @transform_0(%arg0: i32) -> (i32, i32, i32) {
    %c0_i32 = arith.constant 0 : i32
    %c0_i32_0 = arith.constant 0 : i32
    %c0_i32_1 = arith.constant 0 : i32
    return %arg0, %c0_i32, %c0_i32_0 : i32, i32, i32
  }
  func.func @transform_1(%arg0: i32) -> (i32, i32) {
    %c0_i32 = arith.constant 0 : i32
    %c0_i32_0 = arith.constant 0 : i32
    %c0_i32_1 = arith.constant 0 : i32
    return %c0_i32, %c0_i32_0 : i32, i32
  }
  func.func @transform_2(%arg0: i32) -> (i32, i32) {
    %c0_i32 = arith.constant 0 : i32
    %c0_i32_0 = arith.constant 0 : i32
    %c0_i32_1 = arith.constant 0 : i32
    return %c0_i32, %c0_i32_0 : i32, i32
  }
  func.func @transform_3(%arg0: i32) -> (i32, i32) {
    %c0_i32 = arith.constant 0 : i32
    %c0_i32_0 = arith.constant 0 : i32
    %c0_i32_1 = arith.constant 0 : i32
    return %c0_i32, %c0_i32_0 : i32, i32
  }
  func.func @transform_4(%arg0: i32) -> (i32, i32) {
    %c0_i32 = arith.constant 0 : i32
    %c0_i32_0 = arith.constant 0 : i32
    %c0_i32_1 = arith.constant 0 : i32
    return %c0_i32, %c0_i32_0 : i32, i32
  }
  func.func @transform_5(%arg0: i32) -> (i32, i32, i32) {
    %c0_i32 = arith.constant 0 : i32
    %c0_i32_0 = arith.constant 0 : i32
    %c0_i32_1 = arith.constant 0 : i32
    return %arg0, %c0_i32, %c0_i32_0 : i32, i32, i32
  }
  func.func @transform_6(%arg0: i32) -> (i32, i32) {
    %c0_i32 = arith.constant 0 : i32
    %c0_i32_0 = arith.constant 0 : i32
    %c0_i32_1 = arith.constant 0 : i32
    return %c0_i32, %c0_i32_0 : i32, i32
  }
  func.func @transform_7(%arg0: i32) -> (i32, i32) {
    %c0_i32 = arith.constant 0 : i32
    %c0_i32_0 = arith.constant 0 : i32
    %c0_i32_1 = arith.constant 0 : i32
    return %c0_i32, %c0_i32_0 : i32, i32
  }
  func.func @transform_8(%arg0: i32) -> (i32, i32) {
    %c0_i32 = arith.constant 0 : i32
    %c0_i32_0 = arith.constant 0 : i32
    %c0_i32_1 = arith.constant 0 : i32
    return %c0_i32, %c0_i32_0 : i32, i32
  }
}

</mosaic_0001>

<bundles_post_ra>
// kernel: tpu_custom_call.1
= control target key start
LH: loop header
LB: loop body
LE: loop exit
PB: predicated region body
PF: predicated region fallthrough
CT: control target
= control target key end

     0   :  { %13 = vsyncpa [#allocation4], 0  ;;  %s841_s27 = smov 0   ;;  %s927_s0 = inlined_call_operand.vmem [shape: f32[8,2,16], index: 0, kind: input, shape index: {}]   ;;  %s928_s1 = inlined_call_operand.vmem [shape: f32[2,1], index: 1, kind: input, shape index: {}]   ;;  %s929_s2 = inlined_call_operand.vmem [shape: f32[16,32], index: 2, kind: input, shape index: {}]   ;;  %s930_s3 = inlined_call_operand.vmem [shape: f32[32,32], index: 3, kind: input, shape index: {}]   ;;  %s931_s4 = inlined_call_operand.vmem [shape: f32[1,32], index: 4, kind: input, shape index: {}]   ;;  %s932_s5 = inlined_call_operand.vmem [shape: f32[8,32,8], index: 5, kind: input, shape index: {}]   ;;  %s933_s6 = inlined_call_operand.vmem [shape: f32[1,8], index: 6, kind: input, shape index: {}]   ;;  %s934_s7 = inlined_call_operand.vmem [shape: f32[1,8], index: 7, kind: input, shape index: {}]   ;;  %s935_s8 = inlined_call_operand.hbm [shape: f32[2,8], index: 8, kind: output, shape index: {}]  }
   0x1 LB: > { %s847_s28 = sadd.s32 4294967295, %s788_s27   ;;  %p655_p0 = scmp.ge.s32.totalorder %s788_s27, 1  ;;  %s788_s27 = sphi %s841_s27, %s19_s27  }
   0x2   : > { %p267_p1 = scmp.lt.s32.totalorder %s788_s27, 9 }
   0x4   : > { %p268_p2 = pnand %p655_p0, %p267_p1 }
   0x5   : > { %p300_p3 = scmp.lt.s32.totalorder (!%p268_p2), %s847_s28, 7  ;;  %p659_p4 = scmp.ne.s32.totalorder (!%p268_p2), %s847_s28, 0 }
   0x6   : > { %271 = sbr.rel (%p268_p2) target bundleno = 508 (0x1fc), region = 52 }
   0xd   : > { %s301_s29 = scalar_select %p300_p3, %s847_s28, 7 }
   0xe   : > { %312 = sbr.rel (%p659_p4) target bundleno = 21 (0x15), region = 56  ;;  %vm313_vm0 = vcmask (!%p659_p4), 254976   ;;  %vm315_vm1 = vcmask (!%p659_p4), 58368   ;;  %v790_v0 = vmov (!%p659_p4), 0.0  }
   0xf   : > { %s656_s30 = sshll.u32 %s301_s29, 1  ;;  %s671_s9 = sshll.u32 %s301_s29, 5  ;;  %314 = vst.msk [vmem:[#allocation2] sm:$0x3] (!%p659_p4), %vm313_vm0, %v790_v0 }
  0x10   : > { %s303_s12 = scalar_lea.vmem %s927_s0, %s656_s30  ;;  %s859_s15 = scalar_lea.vmem %s932_s5, %s671_s9  ;;  %316 = vst.msk [vmem:[#allocation3] sm:$0x3] (!%p659_p4), %vm315_vm1, %v790_v0 }
  0x15 PF: > { %v321_v1 = vld [vmem:[%s930_s3] sm:$0xff]  ;;  %v322_v2 = vld [vmem:[%s930_s3 + $0x8] sm:$0xff]  ;;  %v791_v4 = vmov 0.0|0.0   ;;  %v323_v7 = vld [vmem:[%s930_s3 + $0x10] sm:$0xff]  ;;  %vm792_vm2 = vmmov 0   ;;  %v793_v10 = vmov 0.0  }
  0x16   : > { %v318_v3 = vld [vmem:[%s929_s2] sm:$0xff]  ;;  %714 = vmatprep.subr.bf16.mxu0 %v791_v4  ;;  %v715_v5 = vpack.c.bf16 %v322_v2, %v321_v1  ;;  %720 = vmatprep.subr.bf16.mxu1 %v791_v4  ;;  %v319_v6 = vld [vmem:[%s929_s2 + $0x8] sm:$0xff]  ;;  %v324_v8 = vld [vmem:[%s930_s3 + $0x18] sm:$0xff]  ;;  %vm399_vm3 = vcmask 130048   ;;  %vm325_vm4 = vcmask 261120   ;;  %vm482_vm5 = vcmask 254976  }
  0x17   : > { %v721_v9 = vpack.c.bf16 %v319_v6, %v318_v3  ;;  %700 = vmatprep.mubr.msk.f32.mxu1 %vm792_vm2, %v793_v10  ;;  %693 = vmatprep.mubr.msk.f32.mxu0 %vm792_vm2, %v793_v10  ;;  %v718_v11 = vpack.c.bf16 %v324_v8, %v323_v7  ;;  %v317_v12 = vld [vmem:[%s303_s12] sm:$0x3]  ;;  %v486_v15 = vld [vmem:[%s859_s15 + $0x8] sm:$0xff]  ;;  %v487_v17 = vld [vmem:[%s859_s15 + $0x10] sm:$0xff]  ;;  %vm563_vm6 = vcmask 58368   ;;  %p664_p5 = scmp.ne.s32.totalorder %s847_s28, 7 }
  0x18   : > { %716 = vmatpush3.bf16.msra.mxu0 %v715_v5  ;;  %v320_v13 = vld [vmem:[#allocation2] sm:$0x3]  ;;  %v488_v18 = vld [vmem:[%s859_s15 + $0x18] sm:$0xff]  ;;  %v484_v28 = vld [vmem:[#allocation3] sm:$0x3]  ;;  %v794_v33 = vmov (!%p664_p5), 0  }
  0x19   : > { %717 = vmatprep.subr.bf16.mxu0 %v791_v4  ;;  %722 = vmatpush3.bf16.msra.mxu1 %v721_v9  ;;  %v485_v14 = vld [vmem:[%s859_s15] sm:$0xff]  ;;  %v727_v19 = vpack.c.bf16 %v488_v18, %v487_v17 }
  0x1a   : > { %723 = vmatprep.subr.bf16.mxu1 %v791_v4  ;;  %v724_v16 = vpack.c.bf16 %v486_v15, %v485_v14  ;;  %v662_v23 = vld [vmem:[%s931_s4] ss:$0 sm:$0xff]  ;;  %751 = vset.pattern.permute.xlu0 (!%p664_p5), %v794_v33 }
  0x1b   : > { %v570_v32 = vld [vmem:[%s928_s1] sm:$0x3] (!%p664_p5) }
  0x1c   : > { %719 = vmatpush3.bf16.msra.mxu0 %v718_v11  ;;  %701 = vmatmul.mubr.msk.f32.vlgmr.msra.gmra.mrb[0].mxu1 %vm399_vm3, %v317_v12  ;;  %v665_v34 = vld [vmem:[%s933_s6] ss:$0 sm:$0xff] (!%p664_p5) }
  0x1d   : > { %711 = vmatprep.mubr.msk.f32.mxu1 %vm792_vm2, %v793_v10  ;;  %725 = vmatpush3.bf16.msra.mxu1 %v724_v16  ;;  %v666_v35 = vld [vmem:[%s934_s7] ss:$0 sm:$0xff] (!%p664_p5) }
  0x1e   : > { %726 = vmatprep.subr.bf16.mxu1 %v791_v4  ;;  %574 = vperm.xlu0 (!%p664_p5), %751, %v570_v32  }
  0x1f   : > { %694 = vmatmul.mubr.msk.f32.vlgmr.msra.gmra.mrb[0].mxu0 %vm325_vm4, %v320_v13 }
  0x21   : > { %728 = vmatpush3.bf16.msra.mxu1 %v727_v19 }
  0x9d   : > { %v575_v36 = vpop.permute.xlu0 (!%p664_p5), %574 }
  0x9e   : > { %v583_v37 = vmul.f32 (!%p664_p5), %v665_v34, %v575_v36 }
  0xa0   : > { %v591_v39 = vadd.f32 (!%p664_p5), %v666_v35, %v583_v37 }
  0xef   : > { %v469_v20 = vpop.f32.mrb[0].mxu1 }
  0xf0   : > { %v702_v21 = vpop.f32.mrb[1].mxu1 }
  0xf2   : > { %v395_v22 = vpop.f32.mrb[0].mxu0 }
  0xf3   : > { %v470_v24 = vadd.f32 %v469_v20, %v395_v22  ;;  %v695_v25 = vpop.f32.mrb[1].mxu0 }
  0xf5   : > { %v480_v26 = vadd.f32 %v662_v23, %v470_v24 }
  0xf7   : > { %749 = vtanh.f32 %v480_v26 }
 0x101   : > { %v750_v27 = vpop.eup %749 }
 0x102   : > { %483 = vst.msk [vmem:[#allocation2] sm:$0x3] %vm482_vm5, %v750_v27  ;;  %712 = vmatmul.mubr.msk.f32.vlgmr.msra.gmra.mrb[2].mxu1 %vm325_vm4, %v750_v27 }
 0x1d2   : > { %568 = sbr.rel (%p664_p5) target bundleno = 483 (0x1e3), region = 60 }
 0x1d5   : > { %v558_v29 = vpop.f32.mrb[2].mxu1 }
 0x1d6   : > { %v562_v30 = vadd.f32 %v558_v29, %v484_v28  ;;  %v713_v31 = vpop.f32.mrb[3].mxu1 }
 0x1d8   : > { %564 = vst.msk [vmem:[#allocation3] sm:$0x3] %vm563_vm6, %v562_v30 }
 0x1df   : > { %v569_v38 = vld [vmem:[#allocation3] sm:$0x3] }
 0x1e0   : > { %v592_v40 = vadd.f32 %v591_v39, %v569_v38 }
 0x1e2   : > { %593 = vst.msk [vmem:[#allocation3] sm:$0x3] %vm563_vm6, %v592_v40 }
 0x1e3 PF: > { %p733_p6 = scmp.eq.s32.totalorder %s847_s28, 7  ;;  %s795_s16 = smov [#allocation3]  }
 0x1e4   : > { %s601_s17 = sshll.u32 %s795_s16, 4  ;;  %s602_s17 = int_to_ptr.vmem [resolvable:$true] %s601_s17 }
 0x1e5   : > { %s752_s18 = scalar_lea.vmem %s602_s17, 32  ;;  %p759_p10 = scmp.lt.s32.totalorder %s602_s17, %s602_s17 }
 0x1e6   : > { %p753_p7 = scmp.ne.s32.totalorder %s602_s17, %s752_s18  ;;  %p760_p11 = scmp.lt.s32.totalorder %s752_s18, %s752_s18 }
 0x1e8   : > { %p754_p8 = pnand %p753_p7, %p733_p6  ;;  %p761_p12 = por %p760_p11, %p759_p10 }
 0x1ea   : > { %p755_p9 = pneg %p754_p8 }
 0x1ec   : > { %p762_p13 = pnand %p761_p12, %p755_p9 }
 0x1ee   : > { %765 = shalt.err (!%p762_p13)
}
 0x1ef   : > { %s766_s21 = scalar_lea.hbm %s935_s8, 32 }
 0x1f0   : > { %p767_p0 = scmp.ne.s32.totalorder %s935_s8, %s766_s21  ;;  %p772_p3 = scmp.lt.u32.totalorder %s766_s21, %s935_s8 }
 0x1f2   : > { %p768_p1 = pnand %p767_p0, %p733_p6 }
 0x1f4   : > { %p769_p2 = pneg %p768_p1 }
 0x1f6   : > { %p774_p4 = pnand %p772_p3, %p769_p2 }
 0x1f8   : > { %777 = shalt.err (!%p774_p4)
}
 0x1f9   : > { %730 = dma.vmem_to_hbm [thread:$0]  (%p733_p6), %s602_s17, 32, %s935_s8, [#allocation4]  }
 0x1fa   : > { %783 = dma.done.wait (%p733_p6), [#allocation4], 32  }
 0x1fb   : > { %785 = vsyncadd (%p733_p6), [#allocation4], 4294967264 }
 0x1fc PF: > { %s19_s27 = sadd.s32 1, %s788_s27  }
 0x1fd   : > { %p16_p5 = scmp.ge.s32.totalorder %s19_s27, 10  }
 0x1ff   :  { %18 = sbr.rel (!%p16_p5) target bundleno = 1 (0x1), region = 90 }
 0x206   :  { %614 = vsyncpa [#allocation4], 1 }
 0x207   :  { %616 = vsyncpa [#allocation4 + $0x1], 1 }

</bundles_post_ra>
